<compile_context>
chip_gen: v6e
topology: v6e:2x2x1
jax: 0.10.0
libtpu: 0.0.40
codegen_flags: <defaults>
</compile_context>

<pallas_src>
import jax
import jax.numpy as jnp
from jax.experimental import pallas as pl
from jax.experimental.pallas import tpu as pltpu

BD = 2                 # batch
CD = 8                 # context_length == sequence length (rope-bug broadcast requires equality)
NH = 4                 # num_heads
HD = 8                 # head_dim
ED = NH * HD           # att_dim = 32
ROPE_BASE = 10000.0
R = BD * CD            # flattened (batch * seq) rows = 16
INV_SCALE = 1.0 / (HD ** 0.5)

HR = NH * R            # 64  : heads-in-sublanes rows  (head, batch, seq)
WC = NH * ED           # 128 : block-diag x width (lane-dense)
QKVW = 3 * HD          # 24  : fused [q|k|v] per-head width
TAB_ROWS = 232         # 3*HR + ED + 1 = 225, padded to a multiple of 8


def precompute_rope(context_length, head_dim, rope_base):
    """Mirrors the reference precompute_rope()."""
    rope_dim = head_dim // 2
    j = jnp.arange(rope_dim, dtype=jnp.float32)
    thetas = 1.0 / rope_base ** (2.0 * j / rope_dim)
    positions = jnp.arange(context_length, dtype=jnp.float32)
    angles = positions[:, None] * thetas[None, :]
    angles = jnp.concatenate([angles, angles], axis=-1)
    return jnp.cos(angles), jnp.sin(angles)          # each (CD, HD)


def _rotate_half_matrix():
    """(ED, ED) block-diagonal signed permutation so that t @ ROT == rotate_half(t) per head."""
    half = HD // 2
    blk = jnp.zeros((HD, HD), dtype=jnp.float32)
    idx = jnp.arange(half)
    blk = blk.at[idx + half, idx].set(-1.0)          # out[:, j <  half] = -t[:, j + half]
    blk = blk.at[idx, idx + half].set(1.0)           # out[:, j >= half] =  t[:, j - half]
    return jnp.kron(jnp.eye(NH, dtype=jnp.float32), blk)


def mha_rope_kernel(x_ref, w_ref, tab_ref, out_ref):
    x = x_ref[...]                                   # (R, ED) = (16, 32)

    blkmask  = tab_ref[0:HR, :]                      # (64, 128) block-diag replication mask
    maskbias = tab_ref[HR:2 * HR, 0:HR]              # (64, 64)  additive 0 / -1e30 attention mask
    sintab   = tab_ref[2 * HR:3 * HR, 0:QKVW]        # (64, 24)  [sin | sin | ones]
    wo       = tab_ref[3 * HR:3 * HR + ED, 0:ED]     # (32, 32)  out_proj weight
    bo       = tab_ref[3 * HR + ED:3 * HR + ED + 1, 0:ED]   # (1, 32) out_proj bias

    # Block-diagonal replication of x: row h*R+r carries x[r,:] only in lane block h.
    # One MXU pass then yields q/k/v for ALL heads directly in heads-in-sublanes layout.
    xr = jnp.concatenate([x] * NH, axis=1)           # (16, 128)
    xb = jnp.concatenate([xr] * NH, axis=0) * blkmask  # (64, 128)

    # Fused projection; rotate_half and 1/sqrt(HD) already folded into the weights.
    qkv = jnp.dot(xb, w_ref[...], preferred_element_type=jnp.float32)   # (64, 24)
    # RoPE (reference bug: cos overwritten by sin) -> (t + rotate_half(t)) * sin; V columns * 1.
    qkv = qkv * sintab

    q = qkv[:, 0:HD]                                 # (64, 8)
    k = qkv[:, HD:2 * HD]
    v = qkv[:, 2 * HD:3 * HD]

    # One attention shot for all heads/batches: block-diagonal causal mask via additive bias.
    s = jax.lax.dot_general(q, k, (((1,), (1,)), ((), ())),
                            preferred_element_type=jnp.float32)          # (64, 64)
    s = s + maskbias
    s = s - jnp.max(s, axis=-1, keepdims=True)
    e = jnp.exp(s)
    p = e * pl.reciprocal(jnp.sum(e, axis=-1, keepdims=True))            # exact (keeps 1e-4 tol)
    o = jnp.dot(p, v, preferred_element_type=jnp.float32)                # (64, 8)

    # "concat heads -> @ Wo" folded into per-head accumulation (avoids a layout transpose back).
    acc = jnp.zeros((R, ED), dtype=jnp.float32)
    for h in range(NH):                              # static unroll, sublane-aligned slices
        acc = acc + jnp.dot(o[h * R:(h + 1) * R, :], wo[h * HD:(h + 1) * HD, :],
                            preferred_element_type=jnp.float32)
    out_ref[...] = (acc + bo).astype(out_ref.dtype)


def _pack_params(wq, wk, wv, wo, bo, sin):
    """Fold rotate_half + scale into weights, fuse q/k/v, and pack all aux data into one table."""
    rope_fold = jnp.eye(ED, dtype=jnp.float32) + _rotate_half_matrix()   # t @ fold = t + rot(t)
    wq_eff = (wq.astype(jnp.float32) @ rope_fold) * INV_SCALE
    wk_eff = wk.astype(jnp.float32) @ rope_fold
    wv_f = wv.astype(jnp.float32)

    # Fused weight stack: row block h holds [Wq_eff | Wk_eff | Wv] columns of head h.
    blocks = []
    for h in range(NH):
        sl = slice(h * HD, (h + 1) * HD)
        blocks.append(jnp.concatenate([wq_eff[:, sl], wk_eff[:, sl], wv_f[:, sl]], axis=1))
    wstack = jnp.concatenate(blocks, axis=0)                              # (128, 24)

    i = jnp.arange(HR)
    j = jnp.arange(WC)
    blkmask = (i[:, None] // R == j[None, :] // ED).astype(jnp.float32)   # (64, 128)

    hi = i // R
    bi = (i % R) // CD
    ci = i % CD
    valid = ((hi[:, None] == hi[None, :]) & (bi[:, None] == bi[None, :])
             & (ci[None, :] <= ci[:, None]))
    maskbias = jnp.where(valid, 0.0, -1e30).astype(jnp.float32)           # (64, 64)

    sin_hs = jnp.tile(sin.astype(jnp.float32), (NH * BD, 1))              # (64, 8): sin[row % CD]
    sintab = jnp.concatenate([sin_hs, sin_hs, jnp.ones_like(sin_hs)], axis=1)   # (64, 24)

    tab = jnp.zeros((TAB_ROWS, WC), dtype=jnp.float32)
    tab = tab.at[0:HR, :].set(blkmask)
    tab = tab.at[HR:2 * HR, 0:HR].set(maskbias)
    tab = tab.at[2 * HR:3 * HR, 0:QKVW].set(sintab)
    tab = tab.at[3 * HR:3 * HR + ED, 0:ED].set(wo.astype(jnp.float32))
    tab = tab.at[3 * HR + ED, 0:ED].set(bo.astype(jnp.float32))
    return wstack, tab


def causal_mha_rope(x, wq, wk, wv, wo, bo, sin):
    bd, cd, ed = x.shape
    assert (bd, cd, ed) == (BD, CD, ED)
    # The reference rope broadcast only works when seq_len == context_length.
    assert sin.shape == (CD, HD), "seq_len must equal context_length (reference rope bug)"

    wstack, tab = _pack_params(wq, wk, wv, wo, bo, sin)
    x2 = x.reshape(R, ED)

    out2 = pl.pallas_call(
        mha_rope_kernel,
        out_shape=jax.ShapeDtypeStruct((R, ED), x.dtype),
        in_specs=[pl.BlockSpec(memory_space=pltpu.MemorySpace.VMEM)] * 3,
        out_specs=pl.BlockSpec(memory_space=pltpu.MemorySpace.VMEM),
    )(x2, wstack, tab)
    return out2.reshape(bd, cd, ed)


# ------------------------- pure-JAX reference (mirrors the torch forward) -------------------------
def ref_forward(x, wq, wk, wv, wo, bo, cos, sin):
    bd, cd, ed = x.shape
    q = (x @ wq).reshape(bd, cd, NH, HD).transpose(0, 2, 1, 3)
    k = (x @ wk).reshape(bd, cd, NH, HD).transpose(0, 2, 1, 3)
    v = (x @ wv).reshape(bd, cd, NH, HD).transpose(0, 2, 1, 3)

    def compute_rope(t):
        tr = t[..., :HD // 2]
        ti = t[..., HD // 2:]
        t2 = jnp.concatenate([-ti, tr], axis=-1)
        c = cos[None, None, :cd, :]
        c = sin[None, None, :cd, :]     # reference bug: cos overwritten by sin
        return t * c + t2 * sin

    q, k = compute_rope(q), compute_rope(k)
    a = q @ jnp.swapaxes(k, -1, -2)
    mask = jnp.triu(jnp.ones((cd, cd), dtype=bool), k=1)
    a = jnp.where(mask, -jnp.inf, a)
    a = jax.nn.softmax(a / HD ** 0.5, axis=-1)
    y = (a @ v).transpose(0, 2, 1, 3).reshape(bd, cd, NH * HD)
    return y @ wo + bo


if __name__ == "__main__":
    key = jax.random.PRNGKey(0)
    ks = jax.random.split(key, 6)

    x = jax.random.normal(ks[0], (BD, CD, ED), dtype=jnp.float32)
    # deterministic synthetic parameters (stored as (in, out))
    wq = 0.1 * jax.random.normal(ks[1], (ED, NH * HD), dtype=jnp.float32)
    wk = 0.1 * jax.random.normal(ks[2], (ED, NH * HD), dtype=jnp.float32)
    wv = 0.1 * jax.random.normal(ks[3], (ED, NH * HD), dtype=jnp.float32)
    wo = 0.1 * jax.random.normal(ks[4], (NH * HD, NH * HD), dtype=jnp.float32)
    bo = 0.1 * jax.random.normal(ks[5], (NH * HD,), dtype=jnp.float32)

    cos, sin = precompute_rope(CD, HD, ROPE_BASE)

    out = causal_mha_rope(x, wq, wk, wv, wo, bo, sin)
    out = jax.block_until_ready(out)

    ref = ref_forward(x, wq, wk, wv, wo, bo, cos, sin)
    assert out.shape == (BD, CD, ED)
    assert jnp.allclose(out, ref, rtol=1e-4, atol=1e-4), "mismatch vs. pure-JAX reference"

    print("KERNEL_OK")
</pallas_src>

<mosaic_0001>
module attributes {stable_mosaic.version = 11 : i64} {
  func.func @mha_rope_kernel(%arg0: memref<16x32xf32, #tpu.memory_space<vmem>>, %arg1: memref<128x24xf32, #tpu.memory_space<vmem>>, %arg2: memref<232x128xf32, #tpu.memory_space<vmem>>, %arg3: memref<16x32xf32, #tpu.memory_space<vmem>>) attributes {dimension_semantics = [], scalar_prefetch = 0 : i64, scratch_operands = 0 : i64, tpu.core_type = #tpu.core_type<tc>} {
    %c0 = arith.constant 0 : index
    %c0_0 = arith.constant 0 : index
    %0 = vector.load %arg0[%c0, %c0_0] : memref<16x32xf32, #tpu.memory_space<vmem>>, vector<16x32xf32>
    %c0_1 = arith.constant 0 : index
    %c0_2 = arith.constant 0 : index
    %1 = vector.load %arg2[%c0_1, %c0_2] : memref<232x128xf32, #tpu.memory_space<vmem>>, vector<64x128xf32>
    %c64 = arith.constant 64 : index
    %c0_3 = arith.constant 0 : index
    %2 = vector.load %arg2[%c64, %c0_3] : memref<232x128xf32, #tpu.memory_space<vmem>>, vector<64x64xf32>
    %c128 = arith.constant 128 : index
    %c0_4 = arith.constant 0 : index
    %3 = vector.load %arg2[%c128, %c0_4] : memref<232x128xf32, #tpu.memory_space<vmem>>, vector<64x24xf32>
    %c192 = arith.constant 192 : index
    %c0_5 = arith.constant 0 : index
    %4 = vector.load %arg2[%c192, %c0_5] : memref<232x128xf32, #tpu.memory_space<vmem>>, vector<32x32xf32>
    %c224 = arith.constant 224 : index
    %c0_6 = arith.constant 0 : index
    %5 = vector.load %arg2[%c224, %c0_6] : memref<232x128xf32, #tpu.memory_space<vmem>>, vector<1x32xf32>
    %6 = tpu.concatenate %0, %0, %0, %0 in 1 : vector<16x32xf32>, vector<16x32xf32>, vector<16x32xf32>, vector<16x32xf32> -> vector<16x128xf32>
    %7 = tpu.concatenate %6, %6, %6, %6 in 0 : vector<16x128xf32>, vector<16x128xf32>, vector<16x128xf32>, vector<16x128xf32> -> vector<64x128xf32>
    %8 = arith.mulf %7, %1 : vector<64x128xf32>
    %c0_7 = arith.constant 0 : index
    %c0_8 = arith.constant 0 : index
    %9 = vector.load %arg1[%c0_7, %c0_8] : memref<128x24xf32, #tpu.memory_space<vmem>>, vector<128x24xf32>
    %cst = arith.constant dense<0.000000e+00> : vector<64x24xf32>
    %10 = tpu.matmul %8, %9, %cst {dimension_numbers = #tpu.dot_dimension_numbers<[1], [0], [0], [1], [0, 0, 1, 1], [], []>} : vector<64x128xf32>, vector<128x24xf32>, vector<64x24xf32> -> vector<64x24xf32>
    %11 = arith.mulf %10, %3 : vector<64x24xf32>
    %12 = vector.extract_strided_slice %11 {offsets = [0, 0], sizes = [64, 8], strides = [1, 1]} : vector<64x24xf32> to vector<64x8xf32>
    %13 = vector.extract_strided_slice %11 {offsets = [0, 8], sizes = [64, 8], strides = [1, 1]} : vector<64x24xf32> to vector<64x8xf32>
    %14 = vector.extract_strided_slice %11 {offsets = [0, 16], sizes = [64, 8], strides = [1, 1]} : vector<64x24xf32> to vector<64x8xf32>
    %cst_9 = arith.constant dense<0.000000e+00> : vector<64x64xf32>
    %15 = tpu.matmul %12, %13, %cst_9 {dimension_numbers = #tpu.dot_dimension_numbers<[1], [1], [0], [0], [0, 0, 1, 0], [], []>} : vector<64x8xf32>, vector<64x8xf32>, vector<64x64xf32> -> vector<64x64xf32>
    %16 = arith.addf %15, %2 : vector<64x64xf32>
    %cst_10 = arith.constant dense<0xFF800000> : vector<64xf32>
    %17 = vector.multi_reduction <maximumf>, %16, %cst_10 [1] : vector<64x64xf32> to vector<64xf32>
    %18 = vector.shape_cast %17 : vector<64xf32> to vector<64x1xf32>
    %19 = vector.broadcast %18 : vector<64x1xf32> to vector<64x64xf32>
    %20 = arith.subf %16, %19 : vector<64x64xf32>
    %21 = math.exp %20 : vector<64x64xf32>
    %cst_11 = arith.constant dense<0.000000e+00> : vector<64xf32>
    %22 = vector.multi_reduction <add>, %21, %cst_11 [1] : vector<64x64xf32> to vector<64xf32>
    %23 = vector.shape_cast %22 : vector<64xf32> to vector<64x1xf32>
    %24 = tpu.reciprocal %23 : vector<64x1xf32> -> vector<64x1xf32>
    %25 = vector.broadcast %24 : vector<64x1xf32> to vector<64x64xf32>
    %26 = arith.mulf %21, %25 : vector<64x64xf32>
    %cst_12 = arith.constant dense<0.000000e+00> : vector<64x8xf32>
    %27 = tpu.matmul %26, %14, %cst_12 {dimension_numbers = #tpu.dot_dimension_numbers<[1], [0], [0], [1], [0, 0, 1, 1], [], []>} : vector<64x64xf32>, vector<64x8xf32>, vector<64x8xf32> -> vector<64x8xf32>
    %cst_13 = arith.constant 0.000000e+00 : f32
    %28 = vector.broadcast %cst_13 : f32 to vector<16x32xf32>
    %29 = vector.extract_strided_slice %27 {offsets = [0, 0], sizes = [16, 8], strides = [1, 1]} : vector<64x8xf32> to vector<16x8xf32>
    %30 = vector.extract_strided_slice %4 {offsets = [0, 0], sizes = [8, 32], strides = [1, 1]} : vector<32x32xf32> to vector<8x32xf32>
    %cst_14 = arith.constant dense<0.000000e+00> : vector<16x32xf32>
    %31 = tpu.matmul %29, %30, %cst_14 {dimension_numbers = #tpu.dot_dimension_numbers<[1], [0], [0], [1], [0, 0, 1, 1], [], []>} : vector<16x8xf32>, vector<8x32xf32>, vector<16x32xf32> -> vector<16x32xf32>
    %32 = arith.addf %28, %31 : vector<16x32xf32>
    %33 = vector.extract_strided_slice %27 {offsets = [16, 0], sizes = [16, 8], strides = [1, 1]} : vector<64x8xf32> to vector<16x8xf32>
    %34 = vector.extract_strided_slice %4 {offsets = [8, 0], sizes = [8, 32], strides = [1, 1]} : vector<32x32xf32> to vector<8x32xf32>
    %cst_15 = arith.constant dense<0.000000e+00> : vector<16x32xf32>
    %35 = tpu.matmul %33, %34, %cst_15 {dimension_numbers = #tpu.dot_dimension_numbers<[1], [0], [0], [1], [0, 0, 1, 1], [], []>} : vector<16x8xf32>, vector<8x32xf32>, vector<16x32xf32> -> vector<16x32xf32>
    %36 = arith.addf %32, %35 : vector<16x32xf32>
    %37 = vector.extract_strided_slice %27 {offsets = [32, 0], sizes = [16, 8], strides = [1, 1]} : vector<64x8xf32> to vector<16x8xf32>
    %38 = vector.extract_strided_slice %4 {offsets = [16, 0], sizes = [8, 32], strides = [1, 1]} : vector<32x32xf32> to vector<8x32xf32>
    %cst_16 = arith.constant dense<0.000000e+00> : vector<16x32xf32>
    %39 = tpu.matmul %37, %38, %cst_16 {dimension_numbers = #tpu.dot_dimension_numbers<[1], [0], [0], [1], [0, 0, 1, 1], [], []>} : vector<16x8xf32>, vector<8x32xf32>, vector<16x32xf32> -> vector<16x32xf32>
    %40 = arith.addf %36, %39 : vector<16x32xf32>
    %41 = vector.extract_strided_slice %27 {offsets = [48, 0], sizes = [16, 8], strides = [1, 1]} : vector<64x8xf32> to vector<16x8xf32>
    %42 = vector.extract_strided_slice %4 {offsets = [24, 0], sizes = [8, 32], strides = [1, 1]} : vector<32x32xf32> to vector<8x32xf32>
    %cst_17 = arith.constant dense<0.000000e+00> : vector<16x32xf32>
    %43 = tpu.matmul %41, %42, %cst_17 {dimension_numbers = #tpu.dot_dimension_numbers<[1], [0], [0], [1], [0, 0, 1, 1], [], []>} : vector<16x8xf32>, vector<8x32xf32>, vector<16x32xf32> -> vector<16x32xf32>
    %44 = arith.addf %40, %43 : vector<16x32xf32>
    %45 = vector.broadcast %5 : vector<1x32xf32> to vector<16x32xf32>
    %46 = arith.addf %44, %45 : vector<16x32xf32>
    %c0_18 = arith.constant 0 : index
    %c0_19 = arith.constant 0 : index
    %47 = vector.load %arg3[%c0_18, %c0_19] : memref<16x32xf32, #tpu.memory_space<vmem>>, vector<16x32xf32>
    tpu.vector_store %arg3[%c0_18, %c0_19], %46 {strides = array<i32>} : memref<16x32xf32, #tpu.memory_space<vmem>>, vector<16x32xf32>,
    return
  }
}

</mosaic_0001>

<bundles_post_ra>
// kernel: tpu_custom_call.1
= control target key start
LH: loop header
LB: loop body
LE: loop exit
PB: predicated region body
PF: predicated region fallthrough
CT: control target
= control target key end

     0   :  { %8 = vsyncpa [#allocation3], 0  ;;  %s1523_s0 = inlined_call_operand.vmem [shape: f32[16,32], index: 0, kind: input, shape index: {}]   ;;  %s1524_s1 = inlined_call_operand.vmem [shape: f32[128,24], index: 1, kind: input, shape index: {}]   ;;  %s1525_s2 = inlined_call_operand.hbm [shape: f32[232,128], index: 2, kind: input, shape index: {}]   ;;  %s1526_s3 = inlined_call_operand.hbm [shape: f32[16,32], index: 3, kind: output, shape index: {}]  }
   0x1   :  { %9 = vsyncpa [#allocation4], 0  ;;  %s1288_s12 = smov [#allocation2]  }
   0x2   :  { %s19_s13 = sshll.u32 %s1288_s12, 4  ;;  %s20_s13 = int_to_ptr.vmem [resolvable:$true] %s19_s13 }
   0x3   :  { %s1252_s14 = scalar_lea.vmem %s20_s13, 3712  ;;  %p1257_p1 = scmp.lt.s32.totalorder %s20_s13, %s20_s13 }
   0x4   :  { %p1253_p0 = scmp.ne.s32.totalorder %s20_s13, %s1252_s14  ;;  %p1258_p2 = scmp.lt.s32.totalorder %s1252_s14, %s1252_s14 }
   0x6   :  { %p1259_p3 = por %p1258_p2, %p1257_p1 }
   0x8   :  { %p1260_p4 = pnand %p1259_p3, %p1253_p0 }
   0xa   :  { %1263 = shalt.err (!%p1260_p4)
}
   0xb   :  { %s1289_s15 = smov 128   ;;  %s1290_s16 = smov 8  }
   0xc   :  { %25 = dma.hbm_to_vmem [thread:$0]  %s1525_s2, 3712, %s20_s13, [#allocation3], %s1289_s15, %s1289_s15, %s1290_s16  }
   0xd   :  { %1284 = dma.done.wait [#allocation3], 3712  }
   0xe   :  { %1285 = vsyncadd [#allocation3], 4294963584  ;;  %v1326_v0 = vld [vmem:[%s1523_s0] sm:$0xff]  ;;  %v112_v1 = vld [vmem:[%s1524_s1 + $0x78] sm:$0xff]  ;;  %s1291_s23 = smov 64   ;;  %s1292_s24 = smov 32  }
   0xf   :  { %68 = vrot.lane.b32.xlu1 %v1326_v0, %s1291_s23  ;;  %62 = vrot.lane.b32.xlu0 %v1326_v0, %s1292_s24  ;;  %v111_v2 = vld [vmem:[%s1524_s1 + $0x70] sm:$0xff]  ;;  %v30_v3 = vld [vmem:[%s1523_s0 + $0x8] sm:$0xff]  ;;  %s1293_s5 = smov 96   ;;  %vm80_vm0 = vcmask 261120   ;;  %vm83_vm1 = vcmask 523264   ;;  %vm86_vm2 = vcmask 785408  }
  0x10   :  { %1083 = vmatprep.subr.mxu0 %v112_v1  ;;  %v110_v4 = vld [vmem:[%s1524_s1 + $0x68] sm:$0xff]  ;;  %v109_v5 = vld [vmem:[%s1524_s1 + $0x60] sm:$0xff]  ;;  %v108_v6 = vld [vmem:[%s1524_s1 + $0x58] sm:$0xff]  ;;  %vm250_vm3 = vcmask 64512   ;;  %s1295_s30 = smov 112   ;;  %s1296_s4 = smov [#allocation5]  }
  0x11   :  { %1084 = vmatpush3.msra.mxu0 %v112_v1  ;;  %v107_v7 = vld [vmem:[%s1524_s1 + $0x50] sm:$0xff]  ;;  %v106_v8 = vld [vmem:[%s1524_s1 + $0x48] sm:$0xff]  ;;  %v105_v9 = vld [vmem:[%s1524_s1 + $0x40] sm:$0xff] }
  0x12   :  { %1085 = vmatprep.subr.mxu0 %v111_v2  ;;  %v104_v10 = vld [vmem:[%s1524_s1 + $0x38] sm:$0xff]  ;;  %v103_v11 = vld [vmem:[%s1524_s1 + $0x30] sm:$0xff]  ;;  %v102_v12 = vld [vmem:[%s1524_s1 + $0x28] sm:$0xff] }
  0x13   :  { %70 = vrot.lane.b32.xlu1 %v30_v3, %s1291_s23  ;;  %64 = vrot.lane.b32.xlu0 %v30_v3, %s1292_s24  ;;  %v101_v13 = vld [vmem:[%s1524_s1 + $0x20] sm:$0xff]  ;;  %v100_v14 = vld [vmem:[%s1524_s1 + $0x18] sm:$0xff]  ;;  %v32_v25 = vld [vmem:[#allocation2 + $0x8] sm:$0xff] }
  0x14   :  { %1086 = vmatpush3.msra.mxu0 %v111_v2  ;;  %v99_v15 = vld [vmem:[%s1524_s1 + $0x10] sm:$0xff]  ;;  %v98_v16 = vld [vmem:[%s1524_s1 + $0x8] sm:$0xff]  ;;  %v97_v17 = vld [vmem:[%s1524_s1] sm:$0xff]  ;;  %s1294_s1 = smov 120  }
  0x15   :  { %1087 = vmatprep.subr.mxu0 %v110_v4  ;;  %v31_v24 = vld [vmem:[#allocation2] sm:$0xff]  ;;  %v33_v32 = vld [vmem:[#allocation2 + $0x10] sm:$0xff]  ;;  %v34_v36 = vld [vmem:[#allocation2 + $0x18] sm:$0xff] }
  0x16   :  { %1088 = vmatpush3.msra.mxu0 %v110_v4  ;;  %v35_v37 = vld [vmem:[#allocation2 + $0x20] sm:$0xff]  ;;  %v36_v40 = vld [vmem:[#allocation2 + $0x28] sm:$0xff]  ;;  %v37_v41 = vld [vmem:[#allocation2 + $0x30] sm:$0xff] }
  0x17   :  { %76 = vrot.lane.b32.xlu1 %v30_v3, %s1293_s5  ;;  %74 = vrot.lane.b32.xlu0 %v1326_v0, %s1293_s5  ;;  %v38_v44 = vld [vmem:[#allocation2 + $0x38] sm:$0xff]  ;;  %v47_v47 = vld [vmem:[#allocation2 + $0x80] sm:$0xff]  ;;  %v53_v56 = vld [vmem:[#allocation2 + $0xb0] sm:$0xff]  ;;  %s970_s5 = sshll.u32 %s1296_s4, 4  ;;  %s971_s5 = int_to_ptr.vmem [resolvable:$true] %s970_s5 }
  0x18   :  { %1089 = vmatprep.subr.mxu0 %v109_v5  ;;  %v54_v54 = vld [vmem:[#allocation2 + $0xb8] sm:$0xff]  ;;  %v52_v58 = vld [vmem:[#allocation2 + $0xa8] sm:$0xff]  ;;  %v51_v61 = vld [vmem:[#allocation2 + $0xa0] sm:$0xff]  ;;  %s1264_s0 = scalar_lea.vmem %s971_s5, 256  ;;  %p1269_p6 = scmp.lt.s32.totalorder %s971_s5, %s971_s5 }
  0x19   :  { %1090 = vmatpush3.msra.mxu0 %v109_v5  ;;  %v50_v63 = vld [vmem:[#allocation2 + $0x98] sm:$0xff]  ;;  %v49_v1 = vld [vmem:[#allocation2 + $0x90] sm:$0xff]  ;;  %p1265_p5 = scmp.ne.s32.totalorder %s971_s5, %s1264_s0  ;;  %p1270_p7 = scmp.lt.s32.totalorder %s1264_s0, %s1264_s0 }
  0x1a   :  { %1091 = vmatprep.subr.mxu0 %v108_v6 }
  0x1b   :  { %1092 = vmatpush3.msra.mxu0 %v108_v6  ;;  %p1271_p8 = por %p1270_p7, %p1269_p6 }
  0x1c   :  { %1093 = vmatprep.subr.mxu0 %v107_v7 }
  0x1d   :  { %1094 = vmatpush3.msra.mxu0 %v107_v7  ;;  %p1272_p9 = pnand %p1271_p8, %p1265_p5 }
  0x1e   :  { %1095 = vmatprep.subr.mxu0 %v106_v8 }
  0x1f   :  { %1096 = vmatpush3.msra.mxu0 %v106_v8 }
  0x20   :  { %1097 = vmatprep.subr.mxu0 %v105_v9 }
  0x21   :  { %1098 = vmatpush3.msra.mxu0 %v105_v9 }
  0x22   :  { %1099 = vmatprep.subr.mxu0 %v104_v10 }
  0x23   :  { %1100 = vmatpush3.msra.mxu0 %v104_v10 }
  0x24   :  { %1101 = vmatprep.subr.mxu0 %v103_v11 }
  0x25   :  { %1102 = vmatpush3.msra.mxu0 %v103_v11 }
  0x26   :  { %1103 = vmatprep.subr.mxu0 %v102_v12 }
  0x27   :  { %1104 = vmatpush3.msra.mxu0 %v102_v12 }
  0x28   :  { %1105 = vmatprep.subr.mxu0 %v101_v13 }
  0x29   :  { %1106 = vmatpush3.msra.mxu0 %v101_v13 }
  0x2a   :  { %1107 = vmatprep.subr.mxu0 %v100_v14 }
  0x2b   :  { %1108 = vmatpush3.msra.mxu0 %v100_v14  ;;  %v40_v14 = vld [vmem:[#allocation2 + $0x48] sm:$0xff] }
  0x2c   :  { %1109 = vmatprep.subr.mxu0 %v99_v15 }
  0x2d   :  { %1110 = vmatpush3.msra.mxu0 %v99_v15 }
  0x2e   :  { %1111 = vmatprep.subr.mxu0 %v98_v16 }
  0x2f   :  { %1112 = vmatpush3.msra.mxu0 %v98_v16  ;;  %v39_v16 = vld [vmem:[#allocation2 + $0x40] sm:$0xff] }
  0x30   :  { %1113 = vmatprep.subr.mxu0 %v97_v17 }
  0x31   :  { %1114 = vmatpush3.msra.mxu0 %v97_v17 }
  0x81   :  { %v69_v18 = vpop.permute.xlu1 %68  ;;  %v63_v19 = vpop.permute.xlu0 %62 }
  0x82   :  { %v81_v22 = vsel %vm80_vm0, %v1326_v0, %v63_v19 }
  0x83   :  { %v84_v28 = vsel %vm83_vm1, %v81_v22, %v69_v18  ;;  %v41_v22 = vld [vmem:[#allocation2 + $0x50] sm:$0xff] }
  0x85   :  { %v71_v20 = vpop.permute.xlu1 %70  ;;  %v65_v21 = vpop.permute.xlu0 %64 }
  0x86   :  { %v82_v23 = vsel %vm80_vm0, %v30_v3, %v65_v21  ;;  %v48_v3 = vld [vmem:[#allocation2 + $0x88] sm:$0xff] }
  0x87   :  { %v85_v27 = vsel %vm83_vm1, %v82_v23, %v71_v20 }
  0x89   :  { %v77_v26 = vpop.permute.xlu1 %76  ;;  %v75_v29 = vpop.permute.xlu0 %74 }
  0x8a   :  { %v88_v30 = vsel %vm86_vm2, %v85_v27, %v77_v26  ;;  %v87_v31 = vsel %vm86_vm2, %v84_v28, %v75_v29 }
  0x8b   :  { %v89_v33 = vmul.f32 %v87_v31, %v31_v24  ;;  %v90_v34 = vmul.f32 %v88_v30, %v32_v25  ;;  %v91_v35 = vmul.f32 %v87_v31, %v33_v32  ;;  %v92_v38 = vmul.f32 %v88_v30, %v34_v36  ;;  %v42_v24 = vld [vmem:[#allocation2 + $0x58] sm:$0xff] }
  0x8c   :  { %v93_v39 = vmul.f32 %v87_v31, %v35_v37  ;;  %v94_v42 = vmul.f32 %v88_v30, %v36_v40  ;;  %v95_v43 = vmul.f32 %v87_v31, %v37_v41  ;;  %v96_v45 = vmul.f32 %v88_v30, %v38_v44  ;;  %v44_v30 = vld [vmem:[#allocation2 + $0x68] sm:$0xff] }
  0x8d   :  { %1115 = vmatprep.mubr.f32.mxu0 %v89_v33 }
  0x8e   :  { %1116 = vmatmul.mubr.f32.vlgmr.msra.gmra.mxu0 %v90_v34  ;;  %v46_v34 = vld [vmem:[#allocation2 + $0x78] sm:$0xff] }
  0x8f   :  { %1118 = vmatprep.mubr.f32.mxu0 %v91_v35 }
  0x92   :  { %1119 = vmatmul.mubr.f32.gmra.mxu0 %v92_v38 }
  0x93   :  { %1121 = vmatprep.mubr.f32.mxu0 %v93_v39  ;;  %v43_v39 = vld [vmem:[#allocation2 + $0x60] sm:$0xff] }
  0x96   :  { %1122 = vmatmul.mubr.f32.gmra.mxu0 %v94_v42 }
  0x97   :  { %1124 = vmatprep.mubr.f32.mxu0 %v95_v43  ;;  %v45_v43 = vld [vmem:[#allocation2 + $0x70] sm:$0xff] }
  0x9a   :  { %1125 = vmatmul.mubr.f32.gmra.mxu0 %v96_v45 }
 0x14e   :  { %v1117_v46 = vpop.f32.mrf.mxu0 }
 0x14f   :  { %v1408_v5 = vmul.f32 %v1117_v46, %v48_v3 }
 0x150   :  { %v179_v48 = vpop.f32.mrf.mxu0 }
 0x151   :  { %v1387_v49 = vmul.f32 %v179_v48, %v47_v47 }
 0x152   :  { %v1120_v50 = vpop.f32.mrf.mxu0 }
 0x153   :  { %1143 = vmatprep.mubr.msk.f32.mxu1 %vm250_vm3, %v1387_v49  ;;  %v1402_v2 = vmul.f32 %v1120_v50, %v50_v63 }
 0x154   :  { %v189_v51 = vpop.f32.mrf.mxu0 }
 0x155   :  { %v1405_v4 = vmul.f32 %v189_v51, %v49_v1 }
 0x156   :  { %v1123_v52 = vpop.f32.mrf.mxu0 }
 0x157   :  { %v1396_v62 = vmul.f32 %v1123_v52, %v52_v58 }
 0x158   :  { %v199_v53 = vpop.f32.mrf.mxu0 }
 0x159   :  { %v1399_v0 = vmul.f32 %v199_v53, %v51_v61 }
 0x15a   :  { %v1126_v55 = vpop.f32.mrf.mxu0 }
 0x15b   :  { %v1391_v57 = vmul.f32 %v1126_v55, %v54_v54 }
 0x15c   :  { %v209_v59 = vpop.f32.mrf.mxu0 }
 0x15d   :  { %v1393_v60 = vmul.f32 %v209_v59, %v53_v56  ;;  %248 = vrot.lane.b32.xlu0 %v1391_v57, %s1294_s1 }
 0x15f   :  { %246 = vrot.lane.b32.xlu1 %v1393_v60, %s1294_s1 }
 0x161   :  { %244 = vrot.lane.b32.xlu0 %v1396_v62, %s1294_s1 }
 0x163   :  { %242 = vrot.lane.b32.xlu1 %v1399_v0, %s1294_s1 }
 0x165   :  { %240 = vrot.lane.b32.xlu0 %v1402_v2, %s1294_s1 }
 0x167   :  { %238 = vrot.lane.b32.xlu1 %v1405_v4, %s1294_s1 }
 0x169   :  { %236 = vrot.lane.b32.xlu0 %v1408_v5, %s1294_s1 }
 0x16b   :  { %234 = vrot.lane.b32.xlu1 %v1387_v49, %s1294_s1 }
 0x1cf   :  { %v249_v6 = vpop.permute.xlu0 %248 }
 0x1d0   :  { %1127 = vmatprep.subr.msk.mxu1 %vm250_vm3, %v249_v6 }
 0x1d1   :  { %1128 = vmatpush3.xpose.msk.msra.mxu1 %vm250_vm3, %v249_v6  ;;  %v247_v7 = vpop.permute.xlu1 %246 }
 0x1d2   :  { %1129 = vmatprep.subr.msk.mxu1 %vm250_vm3, %v247_v7 }
 0x1d3   :  { %v245_v8 = vpop.permute.xlu0 %244 }
 0x1d5   :  { %1130 = vmatpush3.xpose.msk.msra.mxu1 %vm250_vm3, %v247_v7  ;;  %v243_v9 = vpop.permute.xlu1 %242 }
 0x1d6   :  { %1131 = vmatprep.subr.msk.mxu1 %vm250_vm3, %v245_v8 }
 0x1d7   :  { %v241_v10 = vpop.permute.xlu0 %240 }
 0x1d9   :  { %1132 = vmatpush3.xpose.msk.msra.mxu1 %vm250_vm3, %v245_v8  ;;  %v239_v11 = vpop.permute.xlu1 %238 }
 0x1da   :  { %1133 = vmatprep.subr.msk.mxu1 %vm250_vm3, %v243_v9 }
 0x1db   :  { %v237_v12 = vpop.permute.xlu0 %236 }
 0x1dd   :  { %1134 = vmatpush3.xpose.msk.msra.mxu1 %vm250_vm3, %v243_v9  ;;  %v235_v13 = vpop.permute.xlu1 %234 }
 0x1de   :  { %1135 = vmatprep.subr.msk.mxu1 %vm250_vm3, %v241_v10 }
 0x1e1   :  { %1136 = vmatpush3.xpose.msk.msra.mxu1 %vm250_vm3, %v241_v10 }
 0x1e2   :  { %1137 = vmatprep.subr.msk.mxu1 %vm250_vm3, %v239_v11 }
 0x1e5   :  { %1138 = vmatpush3.xpose.msk.msra.mxu1 %vm250_vm3, %v239_v11 }
 0x1e6   :  { %1139 = vmatprep.subr.msk.mxu1 %vm250_vm3, %v237_v12 }
 0x1e9   :  { %1140 = vmatpush3.xpose.msk.msra.mxu1 %vm250_vm3, %v237_v12 }
 0x1ea   :  { %1141 = vmatprep.subr.msk.mxu1 %vm250_vm3, %v235_v13 }
 0x1ed   :  { %1142 = vmatpush3.xpose.msk.msra.mxu1 %vm250_vm3, %v235_v13 }
 0x1f0   :  { %1144 = vmatmul.mubr.msk.f32.vlgmr.msra.gmra.mxu1 %vm250_vm3, %v1408_v5 }
 0x1f1   :  { %1146 = vmatprep.mubr.msk.f32.mxu1 %vm250_vm3, %v1405_v4 }
 0x1f4   :  { %1147 = vmatmul.mubr.msk.f32.gmra.mxu1 %vm250_vm3, %v1402_v2 }
 0x1f5   :  { %1149 = vmatprep.mubr.msk.f32.mxu1 %vm250_vm3, %v1399_v0 }
 0x1f8   :  { %1150 = vmatmul.mubr.msk.f32.gmra.mxu1 %vm250_vm3, %v1396_v62 }
 0x1f9   :  { %1152 = vmatprep.mubr.msk.f32.mxu1 %vm250_vm3, %v1393_v60 }
 0x1fc   :  { %1153 = vmatmul.mubr.msk.f32.gmra.mxu1 %vm250_vm3, %v1391_v57 }
 0x2b0   :  { %v1145_v15 = vpop.f32.mrf.mxu1 }
 0x2b1   :  { %v355_v17 = vadd.f32 %v1145_v15, %v40_v14 }
 0x2b2   :  { %v349_v18 = vpop.f32.mrf.mxu1 }
 0x2b3   :  { %v350_v19 = vadd.f32 %v349_v18, %v39_v16  ;;  %v391_v20 = vsel %vm83_vm1, %v355_v17, -inf }
 0x2b4   :  { %392 = vmax.xlane.f32.xlu1 %v391_v20  ;;  %v1148_v21 = vpop.f32.mrf.mxu1 }
 0x2b5   :  { %v388_v23 = vsel %vm83_vm1, %v350_v19, -inf  ;;  %v365_v28 = vadd.f32 %v1148_v21, %v42_v24 }
 0x2b6   :  { %v359_v25 = vpop.f32.mrf.mxu1  ;;  %389 = vmax.xlane.f32.xlu0 %v388_v23 }
 0x2b7   :  { %v360_v26 = vadd.f32 %v359_v25, %v41_v22  ;;  %v397_v33 = vsel %vm83_vm1, %v365_v28, -inf }
 0x2b8   :  { %v1151_v27 = vpop.f32.mrf.mxu1 }
 0x2b9   :  { %v394_v29 = vsel %vm83_vm1, %v360_v26, -inf  ;;  %v375_v32 = vadd.f32 %v1151_v27, %v44_v30 }
 0x2ba   :  { %v369_v31 = vpop.f32.mrf.mxu1  ;;  %395 = vmax.xlane.f32.xlu0 %v394_v29  ;;  %v56_v29 = vld [vmem:[#allocation2 + $0xc8] sm:$0xff] }
 0x2bb   :  { %v403_v37 = vsel %vm83_vm1, %v375_v32, -inf  ;;  %v370_v40 = vadd.f32 %v369_v31, %v43_v39  ;;  %1183 = vmatprep.subr.mxu1 %v56_v29 }
 0x2bc   :  { %v1154_v35 = vpop.f32.mrf.mxu1  ;;  %1184 = vmatpush3.msra.mxu1 %v56_v29 }
 0x2bd   :  { %v385_v36 = vadd.f32 %v1154_v35, %v46_v34  ;;  %v400_v41 = vsel %vm83_vm1, %v370_v40, -inf }
 0x2be   :  { %398 = vmax.xlane.f32.xlu0 %v397_v33  ;;  %v379_v42 = vpop.f32.mrf.mxu1 }
 0x2bf   :  { %v409_v38 = vsel %vm83_vm1, %v385_v36, -inf  ;;  %v1460_v44 = vadd.f32 %v379_v42, %v45_v43 }
 0x2c1   :  { %v406_v45 = vsel %vm83_vm1, %v1460_v44, -inf }
 0x2c2   :  { %404 = vmax.xlane.f32.xlu0 %v403_v37 }
 0x2c5   :  { %490 = vrot.lane.b32.xlu1 %v1391_v57, %s1295_s30 }
 0x2c6   :  { %410 = vmax.xlane.f32.xlu0 %v409_v38 }
 0x2dc   :  { %488 = vrot.lane.b32.xlu0 %v1393_v60, %s1295_s30 }
 0x2e0   :  { %484 = vrot.lane.b32.xlu0 %v1399_v0, %s1295_s30 }
 0x2e9   :  { %401 = vmax.xlane.f32.xlu1 %v400_v41 }
 0x2fa   :  { %486 = vrot.lane.b32.xlu1 %v1396_v62, %s1295_s30 }
 0x2fe   :  { %482 = vrot.lane.b32.xlu1 %v1402_v2, %s1295_s30 }
 0x322   :  { %407 = vmax.xlane.f32.xlu1 %v406_v45 }
 0x333   :  { %480 = vrot.lane.b32.xlu1 %v1405_v4, %s1295_s30 }
 0x33d   :  { %v393_v46 = vpop.xlane.xlu1 %392 }
 0x33e   :  { %v413_v47 = vsub.f32 %v355_v17, %v393_v46 }
 0x33f   :  { %v390_v48 = vpop.xlane.xlu0 %389 }
 0x340   :  { %v422_v50 = vmul.f32 1.442695, %v413_v47  ;;  %v412_v51 = vsub.f32 %v350_v19, %v390_v48 }
 0x341   :  { %v491_v52 = vpop.permute.xlu1 %490 }
 0x342   :  { %1212 = vpow2.f32 %v422_v50  ;;  %v420_v53 = vmul.f32 1.442695, %v412_v51  ;;  %1155 = vmatprep.subr.mxu0 %v491_v52 }
 0x343   :  { %1156 = vmatpush3.msra.mxu0 %v491_v52  ;;  %v396_v54 = vpop.xlane.xlu0 %395 }
 0x344   :  { %v414_v55 = vsub.f32 %v360_v26, %v396_v54  ;;  %1214 = vpow2.f32 %v420_v53 }
 0x346   :  { %v424_v56 = vmul.f32 1.442695, %v414_v55 }
 0x347   :  { %v399_v57 = vpop.xlane.xlu0 %398 }
 0x348   :  { %v415_v58 = vsub.f32 %v365_v28, %v399_v57  ;;  %1216 = vpow2.f32 %v424_v56  ;;  %v55_v56 = vld [vmem:[#allocation2 + $0xc0] sm:$0xff] }
 0x349   :  { %1188 = vmatprep.subr.mxu1 %v55_v56 }
 0x34a   :  { %v426_v59 = vmul.f32 1.442695, %v415_v58 }
 0x34b   :  { %v405_v60 = vpop.xlane.xlu0 %404 }
 0x34c   :  { %1218 = vpow2.f32 %v426_v59  ;;  %v417_v61 = vsub.f32 %v375_v32, %v405_v60 }
 0x34e   :  { %v430_v62 = vmul.f32 1.442695, %v417_v61  ;;  %v57_v61 = vld [vmem:[#allocation2 + $0xd0] sm:$0xff] }
 0x34f   :  { %v1466_v63 = vpop.eup %1212  ;;  %v411_v0 = vpop.xlane.xlu0 %410 }
 0x350   :  { %1220 = vpow2.f32 %v430_v62  ;;  %v419_v1 = vsub.f32 %v385_v36, %v411_v0  ;;  %v439_v2 = vsel %vm83_vm1, %v1466_v63, 0.0  ;;  %v58_v0 = vld [vmem:[#allocation2 + $0xd8] sm:$0xff] }
 0x351   :  { %440 = vadd.xlane.f32.xlu0 %v439_v2  ;;  %v1215_v4 = vpop.eup %1214 }
 0x352   :  { %v434_v3 = vmul.f32 1.442695, %v419_v1  ;;  %v436_v7 = vsel %vm83_vm1, %v1215_v4, 0.0 }
 0x353   :  { %v489_v6 = vpop.permute.xlu0 %488 }
 0x354   :  { %1222 = vpow2.f32 %v434_v3  ;;  %1157 = vmatprep.subr.mxu0 %v489_v6 }
 0x355   :  { %1158 = vmatpush3.msra.mxu0 %v489_v6  ;;  %v1471_v8 = vpop.eup %1216 }
 0x356   :  { %v442_v10 = vsel %vm83_vm1, %v1471_v8, 0.0 }
 0x357   :  { %437 = vadd.xlane.f32.xlu1 %v436_v7  ;;  %v485_v20 = vpop.permute.xlu0 %484 }
 0x359   :  { %v1473_v9 = vpop.eup %1218 }
 0x35a   :  { %v445_v11 = vsel %vm83_vm1, %v1473_v9, 0.0 }
 0x35b   :  { %443 = vadd.xlane.f32.xlu1 %v442_v10  ;;  %446 = vadd.xlane.f32.xlu0 %v445_v11 }
 0x35d   :  { %v1479_v12 = vpop.eup %1220 }
 0x35e   :  { %v451_v13 = vsel %vm83_vm1, %v1479_v12, 0.0 }
 0x35f   :  { %452 = vadd.xlane.f32.xlu0 %v451_v13  ;;  %v1014_v13 = vld [vmem:[#allocation2 + $0xe0] ss:$0 sm:$0xff] }
 0x361   :  { %v1483_v14 = vpop.eup %1222 }
 0x362   :  { %v457_v15 = vsel %vm83_vm1, %v1483_v14, 0.0 }
 0x363   :  { %458 = vadd.xlane.f32.xlu0 %v457_v15 }
 0x372   :  { %v402_v16 = vpop.xlane.xlu1 %401 }
 0x373   :  { %v416_v17 = vsub.f32 %v370_v40, %v402_v16 }
 0x375   :  { %v428_v18 = vmul.f32 1.442695, %v416_v17 }
 0x376   :  { %v487_v19 = vpop.permute.xlu1 %486 }
 0x377   :  { %1224 = vpow2.f32 %v428_v18  ;;  %1159 = vmatprep.subr.mxu0 %v487_v19 }
 0x378   :  { %1160 = vmatpush3.msra.mxu0 %v487_v19 }
 0x379   :  { %478 = vrot.lane.b32.xlu0 %v1408_v5, %s1295_s30  ;;  %1161 = vmatprep.subr.mxu0 %v485_v20 }
 0x37a   :  { %v483_v21 = vpop.permute.xlu1 %482  ;;  %1162 = vmatpush3.msra.mxu0 %v485_v20 }
 0x37b   :  { %1163 = vmatprep.subr.mxu0 %v483_v21 }
 0x37c   :  { %1164 = vmatpush3.msra.mxu0 %v483_v21 }
 0x384   :  { %v1225_v22 = vpop.eup %1224 }
 0x385   :  { %v448_v23 = vsel %vm83_vm1, %v1225_v22, 0.0 }
 0x386   :  { %449 = vadd.xlane.f32.xlu1 %v448_v23 }
 0x3ab   :  { %v408_v24 = vpop.xlane.xlu1 %407 }
 0x3ac   :  { %v418_v25 = vsub.f32 %v1460_v44, %v408_v24 }
 0x3ae   :  { %v432_v26 = vmul.f32 1.442695, %v418_v25 }
 0x3af   :  { %v481_v27 = vpop.permute.xlu1 %480 }
 0x3b0   :  { %1226 = vpow2.f32 %v432_v26  ;;  %1165 = vmatprep.subr.mxu0 %v481_v27 }
 0x3b1   :  { %1166 = vmatpush3.msra.mxu0 %v481_v27 }
 0x3bd   :  { %v1227_v28 = vpop.eup %1226 }
 0x3be   :  { %v454_v5 = vsel %vm83_vm1, %v1227_v28, 0.0 }
 0x3bf   :  { %455 = vadd.xlane.f32.xlu1 %v454_v5 }
 0x3d0   :  { %476 = vrot.lane.b32.xlu1 %v1387_v49, %s1295_s30 }
 0x3da   :  { %v441_v30 = vpop.xlane.xlu0 %440 }
 0x3e0   :  { %v438_v31 = vpop.xlane.xlu1 %437 }
 0x3e1   :  { %1228 = vrcp.f32 %v438_v31 }
 0x3e2   :  { %1230 = vrcp.f32 %v441_v30 }
 0x3e4   :  { %v447_v32 = vpop.xlane.xlu0 %446  ;;  %v444_v38 = vpop.xlane.xlu1 %443 }
 0x3e5   :  { %1232 = vrcp.f32 %v444_v38 }
 0x3e6   :  { %1234 = vrcp.f32 %v447_v32 }
 0x3e8   :  { %v453_v33 = vpop.xlane.xlu0 %452 }
 0x3ec   :  { %v459_v34 = vpop.xlane.xlu0 %458 }
 0x3ee   :  { %v1229_v35 = vpop.eup %1228 }
 0x3ef   :  { %v468_v36 = vmul.f32 %v1229_v35, %v1215_v4  ;;  %v1231_v40 = vpop.eup %1230 }
 0x3f0   :  { %v479_v37 = vpop.permute.xlu0 %478  ;;  %v469_v43 = vmul.f32 %v1231_v40, %v1466_v63 }
 0x3f1   :  { %1167 = vmatprep.subr.mxu0 %v479_v37  ;;  %1171 = vmatprep.mubr.msk.f32.mxu0 %vm83_vm1, %v468_v36 }
 0x3f2   :  { %1168 = vmatpush3.msra.mxu0 %v479_v37  ;;  %v1233_v41 = vpop.eup %1232 }
 0x3f3   :  { %v1235_v44 = vpop.eup %1234  ;;  %v470_v45 = vmul.f32 %v1233_v41, %v1471_v8 }
 0x3f4   :  { %v471_v47 = vmul.f32 %v1235_v44, %v1473_v9 }
 0x40f   :  { %v450_v49 = vpop.xlane.xlu1 %449 }
 0x410   :  { %1236 = vrcp.f32 %v450_v49 }
 0x411   :  { %1238 = vrcp.f32 %v453_v33 }
 0x412   :  { %1240 = vrcp.f32 %v459_v34 }
 0x41d   :  { %v1237_v46 = vpop.eup %1236 }
 0x41e   :  { %v1239_v48 = vpop.eup %1238  ;;  %v472_v50 = vmul.f32 %v1237_v46, %v1225_v22 }
 0x41f   :  { %v1241_v51 = vpop.eup %1240  ;;  %v473_v52 = vmul.f32 %v1239_v48, %v1479_v12 }
 0x420   :  { %v475_v55 = vmul.f32 %v1241_v51, %v1483_v14 }
 0x448   :  { %v456_v39 = vpop.xlane.xlu1 %455 }
 0x449   :  { %1242 = vrcp.f32 %v456_v39 }
 0x44c   :  { %v477_v42 = vpop.permute.xlu1 %476 }
 0x44d   :  { %1169 = vmatprep.subr.mxu0 %v477_v42 }
 0x44e   :  { %1170 = vmatpush3.msra.mxu0 %v477_v42 }
 0x44f   :  { %1172 = vmatmul.mubr.msk.f32.vlgmr.msra.gmra.mxu0 %vm83_vm1, %v469_v43 }
 0x450   :  { %1174 = vmatprep.mubr.msk.f32.mxu0 %vm83_vm1, %v470_v45 }
 0x453   :  { %1175 = vmatmul.mubr.msk.f32.gmra.mxu0 %vm83_vm1, %v471_v47 }
 0x454   :  { %1177 = vmatprep.mubr.msk.f32.mxu0 %vm83_vm1, %v472_v50 }
 0x456   :  { %v1243_v53 = vpop.eup %1242 }
 0x457   :  { %1178 = vmatmul.mubr.msk.f32.gmra.mxu0 %vm83_vm1, %v473_v52  ;;  %v474_v54 = vmul.f32 %v1243_v53, %v1227_v28 }
 0x459   :  { %1180 = vmatprep.mubr.msk.f32.mxu0 %vm83_vm1, %v474_v54 }
 0x45b   :  { %1181 = vmatmul.mubr.msk.f32.gmra.mxu0 %vm83_vm1, %v475_v55 }
 0x50f   :  { %v1173_v57 = vpop.f32.mrf.mxu0 }
 0x511   :  { %v590_v58 = vpop.f32.mrf.mxu0 }
 0x513   :  { %v1176_v59 = vpop.f32.mrf.mxu0 }
 0x515   :  { %v600_v60 = vpop.f32.mrf.mxu0 }
 0x516   :  { %1185 = vmatprep.mubr.msk.f32.mxu1 %vm250_vm3, %v600_v60 }
 0x517   :  { %v1179_v62 = vpop.f32.mrf.mxu0  ;;  %1186 = vmatmul.mubr.msk.f32.vlgmr.msra.gmra.mxu1 %vm250_vm3, %v1176_v59 }
 0x518   :  { %1189 = vmatpush3.msra.mxu1 %v55_v56  ;;  %1190 = vmatprep.mubr.msk.f32.mxu1 %vm250_vm3, %v590_v58 }
 0x519   :  { %v610_v63 = vpop.f32.mrf.mxu0  ;;  %1193 = vmatprep.subr.mxu1 %v57_v61 }
 0x51b   :  { %v1182_v1 = vpop.f32.mrf.mxu0  ;;  %1191 = vmatmul.mubr.msk.f32.vlgmr.msra.gmra.mxu1 %vm250_vm3, %v1173_v57 }
 0x51c   :  { %1194 = vmatpush3.msra.mxu1 %v57_v61  ;;  %1195 = vmatprep.mubr.msk.f32.mxu1 %vm250_vm3, %v610_v63 }
 0x51d   :  { %1198 = vmatprep.subr.mxu1 %v58_v0  ;;  %v620_v2 = vpop.f32.mrf.mxu0 }
 0x51f   :  { %1196 = vmatmul.mubr.msk.f32.vlgmr.msra.gmra.mxu1 %vm250_vm3, %v1179_v62 }
 0x520   :  { %1199 = vmatpush3.msra.mxu1 %v58_v0  ;;  %1200 = vmatprep.mubr.msk.f32.mxu1 %vm250_vm3, %v620_v2 }
 0x523   :  { %1201 = vmatmul.mubr.msk.f32.vlgmr.msra.gmra.mxu1 %vm250_vm3, %v1182_v1 }
 0x5d7   :  { %v1187_v3 = vpop.f32.mrf.mxu1 }
 0x5d9   :  { %v701_v4 = vpop.f32.mrf.mxu1 }
 0x5db   :  { %v1192_v6 = vpop.f32.mrf.mxu1 }
 0x5dc   :  { %v788_v9 = vadd.f32 %v1192_v6, %v1187_v3 }
 0x5dd   :  { %v782_v7 = vpop.f32.mrf.mxu1 }
 0x5de   :  { %v783_v11 = vadd.f32 %v782_v7, %v701_v4 }
 0x5df   :  { %v1197_v8 = vpop.f32.mrf.mxu1 }
 0x5e0   :  { %v873_v12 = vadd.f32 %v1197_v8, %v788_v9 }
 0x5e1   :  { %v863_v10 = vpop.f32.mrf.mxu1 }
 0x5e2   :  { %v872_v15 = vadd.f32 %v863_v10, %v783_v11 }
 0x5e3   :  { %v1202_v14 = vpop.f32.mrf.mxu1 }
 0x5e4   :  { %v956_v16 = vadd.f32 %v1202_v14, %v873_v12 }
 0x5e5   :  { %v946_v17 = vpop.f32.mrf.mxu1 }
 0x5e6   :  { %v962_v18 = vadd.f32 %v1014_v13, %v956_v16  ;;  %v955_v19 = vadd.f32 %v946_v17, %v872_v15 }
 0x5e8   :  { %964 = vst.msk [vmem:[#allocation5 + $0x8] sm:$0xff] %vm80_vm0, %v962_v18  ;;  %v961_v20 = vadd.f32 %v1014_v13, %v955_v19 }
 0x5ea   :  { %963 = vst.msk [vmem:[#allocation5] sm:$0xff] %vm80_vm0, %v961_v20 }
 0x5eb   :  { %1275 = shalt.err (!%p1272_p9)
}
 0x5ec   :  { %976 = dma.vmem_to_hbm [thread:$0]  %s971_s5, 256, %s1526_s3, [#allocation4], %s1289_s15, %s1289_s15, %s1290_s16  }
 0x5ed   :  { %1286 = dma.done.wait [#allocation4], 256  }
 0x5ee   :  { %1287 = vsyncadd [#allocation4], 4294967040 }
 0x5ef   :  { %980 = vsyncpa [#allocation3], 1 }
 0x5f0   :  { %981 = vsyncpa [#allocation4], 1 }

</bundles_post_ra>
